<compile_context>
chip_gen: v6e
topology: v6e:2x2x1
jax: 0.10.0
libtpu: 0.0.40
codegen_flags: <defaults>
</compile_context>

<pallas_src>
import numpy as np
import jax
import jax.numpy as jnp
from jax.experimental import pallas as pl
from jax.experimental.pallas import tpu as pltpu


def _vspec():
    # Whole-array block resident in VMEM (no grid: everything fits easily).
    return pl.BlockSpec(memory_space=pltpu.MemorySpace.VMEM)


# ---------------- fused Pallas kernel (entire forward pass) ----------------

def _make_fused_kernel(n_blocks):
    """Builds a kernel whose arity matches the (static) number of blocks.

    Ref order: x, stem_w, stem_b, [w1, b1, w2, b2] * n_blocks, head_w, head_b,
               out.
    All BN affines are pre-folded into the weights; the head weight already
    includes the skew scatter and is padded to a lane-dense width.
    """

    def kernel(*refs):
        idx = 0
        x = refs[idx][...]; idx += 1
        sw = refs[idx][...]; idx += 1
        sb = refs[idx][...]; idx += 1

        # Stem: Linear (BN folded) + ReLU.
        h = jnp.maximum(
            jnp.dot(x, sw, preferred_element_type=jnp.float32) + sb, 0.0)

        # Residual blocks (static Python loop — unrolled at trace time).
        for _ in range(n_blocks):
            w1 = refs[idx][...]; b1 = refs[idx + 1][...]
            w2 = refs[idx + 2][...]; b2 = refs[idx + 3][...]
            idx += 4
            h1 = jnp.maximum(
                jnp.dot(h, w1, preferred_element_type=jnp.float32) + b1, 0.0)
            h2 = jnp.dot(h1, w2, preferred_element_type=jnp.float32) + b2
            h = jnp.maximum(h2 + h, 0.0)

        # Head: Linear with the skew scatter folded in (lane-padded output).
        hw = refs[idx][...]; hb = refs[idx + 1][...]
        o_ref = refs[idx + 2]
        y = jnp.dot(h, hw, preferred_element_type=jnp.float32) + hb
        o_ref[...] = y.astype(o_ref.dtype)

    return kernel


def param_skew_symmetric_forward(params_in, fused, koopman_dim):
    """Single pallas_call for the whole module; returns (B, K, K)."""
    n_blocks = len(fused["blocks"])
    args = [params_in, fused["stem_w"], fused["stem_b"]]
    for blk in fused["blocks"]:
        args += [blk["w1"], blk["b1"], blk["w2"], blk["b2"]]
    args += [fused["head_w"], fused["head_b"]]

    B = params_in.shape[0]
    out_lanes = fused["head_w"].shape[1]          # padded to a multiple of 128
    flat = pl.pallas_call(
        _make_fused_kernel(n_blocks),
        out_shape=jax.ShapeDtypeStruct((B, out_lanes), params_in.dtype),
        in_specs=[_vspec()] * len(args),
        out_specs=_vspec(),
    )(*args)

    kk = koopman_dim * koopman_dim
    return flat[:, :kk].reshape(B, koopman_dim, koopman_dim)


# ---------------- parameter setup & folding (plain JAX glue) ----------------

def build_scatter_matrix(K):
    """(P, K*K) matrix S with S[t, i*K+j]=+1, S[t, j*K+i]=-1 for the t-th
    strictly-lower-triangular position (matches torch.tril_indices(K,K,-1))."""
    P = K * (K - 1) // 2
    rows, cols = np.tril_indices(K, k=-1)
    S = np.zeros((P, K * K), dtype=np.float32)
    t = np.arange(P)
    S[t, rows * K + cols] = 1.0
    S[t, cols * K + rows] = -1.0
    return jnp.asarray(S)


def init_model(key, params_dim, hidden, koopman_dim, n_blocks):
    """Raw (un-folded) parameters: Linear weights/biases and BN stats."""
    P = koopman_dim * (koopman_dim - 1) // 2
    keys = jax.random.split(key, 4 + 4 * n_blocks)
    ki = iter(range(len(keys)))

    def lin(kk, fan_in, fan_out):
        w = jax.random.normal(kk, (fan_in, fan_out), jnp.float32) / np.sqrt(fan_in)
        b = jnp.zeros((1, fan_out), jnp.float32)
        return {"w": w, "b": b}

    def bn(kk, dim):
        gamma = 1.0 + 0.1 * jax.random.normal(kk, (dim,), jnp.float32)
        beta = 0.1 * jax.random.normal(jax.random.fold_in(kk, 1), (dim,), jnp.float32)
        mean = jnp.zeros((dim,), jnp.float32)   # eval-mode running stats
        var = jnp.ones((dim,), jnp.float32)
        return {"gamma": gamma, "beta": beta, "mean": mean, "var": var}

    model = {"stem": {"lin": lin(keys[next(ki)], params_dim, hidden),
                      "bn": bn(keys[next(ki)], hidden)}}
    blocks = []
    for _ in range(n_blocks):
        blocks.append({"lin1": lin(keys[next(ki)], hidden, hidden),
                       "bn1": bn(keys[next(ki)], hidden),
                       "lin2": lin(keys[next(ki)], hidden, hidden),
                       "bn2": bn(keys[next(ki)], hidden)})
    model["blocks"] = blocks
    model["head"] = lin(keys[next(ki)], hidden, P)
    model["scatter"] = build_scatter_matrix(koopman_dim)
    return model


def fold_model(model, koopman_dim, eps=1e-5):
    """Fold BN into Linear weights and the skew scatter into the head.

    Also pads the head output to a multiple of 128 lanes so the kernel's
    final store is lane-dense (unmasked vst)."""

    def fold_lin_bn(lin, bn):
        scale = bn["gamma"] / jnp.sqrt(bn["var"] + eps)            # (F,)
        shift = bn["beta"] - bn["mean"] * scale                    # (F,)
        w = lin["w"] * scale[None, :]                              # (in, F)
        b = lin["b"] * scale[None, :] + shift[None, :]             # (1, F)
        return w, b

    fused = {}
    fused["stem_w"], fused["stem_b"] = fold_lin_bn(model["stem"]["lin"],
                                                   model["stem"]["bn"])
    blocks = []
    for blk in model["blocks"]:
        w1, b1 = fold_lin_bn(blk["lin1"], blk["bn1"])
        w2, b2 = fold_lin_bn(blk["lin2"], blk["bn2"])
        blocks.append({"w1": w1, "b1": b1, "w2": w2, "b2": b2})
    fused["blocks"] = blocks

    # Head: fold the +/-1 scatter matrix, then pad lanes to a multiple of 128.
    S = model["scatter"]                                           # (P, K*K)
    kk = koopman_dim * koopman_dim
    kk_pad = ((kk + 127) // 128) * 128
    hw = model["head"]["w"] @ S                                    # (hidden, K*K)
    hb = model["head"]["b"] @ S                                    # (1, K*K)
    hw = jnp.pad(hw, ((0, 0), (0, kk_pad - kk)))
    hb = jnp.pad(hb, ((0, 0), (0, kk_pad - kk)))
    fused["head_w"], fused["head_b"] = hw, hb
    return fused


# ---------------- pure-JAX reference (un-folded params, for verification) ----

def reference_forward(params_in, model, koopman_dim, eps=1e-5):
    def bn_apply(y, bn):
        scale = bn["gamma"] / jnp.sqrt(bn["var"] + eps)
        return (y - bn["mean"]) * scale + bn["beta"]

    stem = model["stem"]
    h = jnp.maximum(
        bn_apply(params_in @ stem["lin"]["w"] + stem["lin"]["b"], stem["bn"]), 0.0)
    for blk in model["blocks"]:
        h1 = jnp.maximum(
            bn_apply(h @ blk["lin1"]["w"] + blk["lin1"]["b"], blk["bn1"]), 0.0)
        h2 = bn_apply(h1 @ blk["lin2"]["w"] + blk["lin2"]["b"], blk["bn2"])
        h = jnp.maximum(h2 + h, 0.0)
    p = h @ model["head"]["w"] + model["head"]["b"]

    B = params_in.shape[0]
    rows, cols = np.tril_indices(koopman_dim, k=-1)
    M = jnp.zeros((B, koopman_dim, koopman_dim), jnp.float32)
    M = M.at[:, rows, cols].set(p)
    return M - jnp.transpose(M, (0, 2, 1))


if __name__ == "__main__":
    B = 8            # batch
    params_dim = 4   # ResNet input features
    hidden = 32      # ResNet hidden width
    koopman_dim = 8  # K -> output (B, 8, 8), P = 28
    n_blocks = 2     # `layers`

    key = jax.random.PRNGKey(0)
    k_model, k_x = jax.random.split(key)
    model = init_model(k_model, params_dim, hidden, koopman_dim, n_blocks)
    fused = fold_model(model, koopman_dim)
    x = jax.random.normal(k_x, (B, params_dim), jnp.float32)

    out = param_skew_symmetric_forward(x, fused, koopman_dim)
    out = jax.block_until_ready(out)

    ref = reference_forward(x, model, koopman_dim)
    assert out.shape == (B, koopman_dim, koopman_dim)
    np.testing.assert_allclose(np.asarray(out), np.asarray(ref),
                               rtol=1e-5, atol=1e-5)
    # skew-symmetry sanity check
    np.testing.assert_allclose(np.asarray(out),
                               -np.transpose(np.asarray(out), (0, 2, 1)),
                               rtol=1e-6, atol=1e-6)
    print("KERNEL_OK")
</pallas_src>

<mosaic_0001>
module attributes {stable_mosaic.version = 11 : i64} {
  func.func @kernel(%arg0: memref<8x4xf32, #tpu.memory_space<vmem>>, %arg1: memref<4x32xf32, #tpu.memory_space<vmem>>, %arg2: memref<1x32xf32, #tpu.memory_space<vmem>>, %arg3: memref<32x32xf32, #tpu.memory_space<vmem>>, %arg4: memref<1x32xf32, #tpu.memory_space<vmem>>, %arg5: memref<32x32xf32, #tpu.memory_space<vmem>>, %arg6: memref<1x32xf32, #tpu.memory_space<vmem>>, %arg7: memref<32x32xf32, #tpu.memory_space<vmem>>, %arg8: memref<1x32xf32, #tpu.memory_space<vmem>>, %arg9: memref<32x32xf32, #tpu.memory_space<vmem>>, %arg10: memref<1x32xf32, #tpu.memory_space<vmem>>, %arg11: memref<32x128xf32, #tpu.memory_space<vmem>>, %arg12: memref<1x128xf32, #tpu.memory_space<vmem>>, %arg13: memref<8x128xf32, #tpu.memory_space<vmem>>) attributes {dimension_semantics = [], scalar_prefetch = 0 : i64, scratch_operands = 0 : i64, tpu.core_type = #tpu.core_type<tc>} {
    %c0 = arith.constant 0 : index
    %c0_0 = arith.constant 0 : index
    %0 = vector.load %arg0[%c0, %c0_0] : memref<8x4xf32, #tpu.memory_space<vmem>>, vector<8x4xf32>
    %c0_1 = arith.constant 0 : index
    %c0_2 = arith.constant 0 : index
    %1 = vector.load %arg1[%c0_1, %c0_2] : memref<4x32xf32, #tpu.memory_space<vmem>>, vector<4x32xf32>
    %c0_3 = arith.constant 0 : index
    %c0_4 = arith.constant 0 : index
    %2 = vector.load %arg2[%c0_3, %c0_4] : memref<1x32xf32, #tpu.memory_space<vmem>>, vector<1x32xf32>
    %cst = arith.constant dense<0.000000e+00> : vector<8x32xf32>
    %3 = tpu.matmul %0, %1, %cst {dimension_numbers = #tpu.dot_dimension_numbers<[1], [0], [0], [1], [0, 0, 1, 1], [], []>} : vector<8x4xf32>, vector<4x32xf32>, vector<8x32xf32> -> vector<8x32xf32>
    %4 = vector.broadcast %2 : vector<1x32xf32> to vector<8x32xf32>
    %5 = arith.addf %3, %4 : vector<8x32xf32>
    %cst_5 = arith.constant 0.000000e+00 : f32
    %6 = vector.broadcast %cst_5 : f32 to vector<8x32xf32>
    %7 = arith.maximumf %5, %6 : vector<8x32xf32>
    %c0_6 = arith.constant 0 : index
    %c0_7 = arith.constant 0 : index
    %8 = vector.load %arg3[%c0_6, %c0_7] : memref<32x32xf32, #tpu.memory_space<vmem>>, vector<32x32xf32>
    %c0_8 = arith.constant 0 : index
    %c0_9 = arith.constant 0 : index
    %9 = vector.load %arg4[%c0_8, %c0_9] : memref<1x32xf32, #tpu.memory_space<vmem>>, vector<1x32xf32>
    %c0_10 = arith.constant 0 : index
    %c0_11 = arith.constant 0 : index
    %10 = vector.load %arg5[%c0_10, %c0_11] : memref<32x32xf32, #tpu.memory_space<vmem>>, vector<32x32xf32>
    %c0_12 = arith.constant 0 : index
    %c0_13 = arith.constant 0 : index
    %11 = vector.load %arg6[%c0_12, %c0_13] : memref<1x32xf32, #tpu.memory_space<vmem>>, vector<1x32xf32>
    %cst_14 = arith.constant dense<0.000000e+00> : vector<8x32xf32>
    %12 = tpu.matmul %7, %8, %cst_14 {dimension_numbers = #tpu.dot_dimension_numbers<[1], [0], [0], [1], [0, 0, 1, 1], [], []>} : vector<8x32xf32>, vector<32x32xf32>, vector<8x32xf32> -> vector<8x32xf32>
    %13 = vector.broadcast %9 : vector<1x32xf32> to vector<8x32xf32>
    %14 = arith.addf %12, %13 : vector<8x32xf32>
    %cst_15 = arith.constant 0.000000e+00 : f32
    %15 = vector.broadcast %cst_15 : f32 to vector<8x32xf32>
    %16 = arith.maximumf %14, %15 : vector<8x32xf32>
    %cst_16 = arith.constant dense<0.000000e+00> : vector<8x32xf32>
    %17 = tpu.matmul %16, %10, %cst_16 {dimension_numbers = #tpu.dot_dimension_numbers<[1], [0], [0], [1], [0, 0, 1, 1], [], []>} : vector<8x32xf32>, vector<32x32xf32>, vector<8x32xf32> -> vector<8x32xf32>
    %18 = vector.broadcast %11 : vector<1x32xf32> to vector<8x32xf32>
    %19 = arith.addf %17, %18 : vector<8x32xf32>
    %20 = arith.addf %19, %7 : vector<8x32xf32>
    %cst_17 = arith.constant 0.000000e+00 : f32
    %21 = vector.broadcast %cst_17 : f32 to vector<8x32xf32>
    %22 = arith.maximumf %20, %21 : vector<8x32xf32>
    %c0_18 = arith.constant 0 : index
    %c0_19 = arith.constant 0 : index
    %23 = vector.load %arg7[%c0_18, %c0_19] : memref<32x32xf32, #tpu.memory_space<vmem>>, vector<32x32xf32>
    %c0_20 = arith.constant 0 : index
    %c0_21 = arith.constant 0 : index
    %24 = vector.load %arg8[%c0_20, %c0_21] : memref<1x32xf32, #tpu.memory_space<vmem>>, vector<1x32xf32>
    %c0_22 = arith.constant 0 : index
    %c0_23 = arith.constant 0 : index
    %25 = vector.load %arg9[%c0_22, %c0_23] : memref<32x32xf32, #tpu.memory_space<vmem>>, vector<32x32xf32>
    %c0_24 = arith.constant 0 : index
    %c0_25 = arith.constant 0 : index
    %26 = vector.load %arg10[%c0_24, %c0_25] : memref<1x32xf32, #tpu.memory_space<vmem>>, vector<1x32xf32>
    %cst_26 = arith.constant dense<0.000000e+00> : vector<8x32xf32>
    %27 = tpu.matmul %22, %23, %cst_26 {dimension_numbers = #tpu.dot_dimension_numbers<[1], [0], [0], [1], [0, 0, 1, 1], [], []>} : vector<8x32xf32>, vector<32x32xf32>, vector<8x32xf32> -> vector<8x32xf32>
    %28 = vector.broadcast %24 : vector<1x32xf32> to vector<8x32xf32>
    %29 = arith.addf %27, %28 : vector<8x32xf32>
    %cst_27 = arith.constant 0.000000e+00 : f32
    %30 = vector.broadcast %cst_27 : f32 to vector<8x32xf32>
    %31 = arith.maximumf %29, %30 : vector<8x32xf32>
    %cst_28 = arith.constant dense<0.000000e+00> : vector<8x32xf32>
    %32 = tpu.matmul %31, %25, %cst_28 {dimension_numbers = #tpu.dot_dimension_numbers<[1], [0], [0], [1], [0, 0, 1, 1], [], []>} : vector<8x32xf32>, vector<32x32xf32>, vector<8x32xf32> -> vector<8x32xf32>
    %33 = vector.broadcast %26 : vector<1x32xf32> to vector<8x32xf32>
    %34 = arith.addf %32, %33 : vector<8x32xf32>
    %35 = arith.addf %34, %22 : vector<8x32xf32>
    %cst_29 = arith.constant 0.000000e+00 : f32
    %36 = vector.broadcast %cst_29 : f32 to vector<8x32xf32>
    %37 = arith.maximumf %35, %36 : vector<8x32xf32>
    %c0_30 = arith.constant 0 : index
    %c0_31 = arith.constant 0 : index
    %38 = vector.load %arg11[%c0_30, %c0_31] : memref<32x128xf32, #tpu.memory_space<vmem>>, vector<32x128xf32>
    %c0_32 = arith.constant 0 : index
    %c0_33 = arith.constant 0 : index
    %39 = vector.load %arg12[%c0_32, %c0_33] : memref<1x128xf32, #tpu.memory_space<vmem>>, vector<1x128xf32>
    %cst_34 = arith.constant dense<0.000000e+00> : vector<8x128xf32>
    %40 = tpu.matmul %37, %38, %cst_34 {dimension_numbers = #tpu.dot_dimension_numbers<[1], [0], [0], [1], [0, 0, 1, 1], [], []>} : vector<8x32xf32>, vector<32x128xf32>, vector<8x128xf32> -> vector<8x128xf32>
    %41 = vector.broadcast %39 : vector<1x128xf32> to vector<8x128xf32>
    %42 = arith.addf %40, %41 : vector<8x128xf32>
    %c0_35 = arith.constant 0 : index
    %c0_36 = arith.constant 0 : index
    %43 = vector.load %arg13[%c0_35, %c0_36] : memref<8x128xf32, #tpu.memory_space<vmem>>, vector<8x128xf32>
    tpu.vector_store %arg13[%c0_35, %c0_36], %42 {strides = array<i32>} : memref<8x128xf32, #tpu.memory_space<vmem>>, vector<8x128xf32>,
    return
  }
}

</mosaic_0001>

<bundles_post_ra>
// kernel: tpu_custom_call.1
= control target key start
LH: loop header
LB: loop body
LE: loop exit
PB: predicated region body
PF: predicated region fallthrough
CT: control target
= control target key end

     0   :  { %18 = vsyncpa [#allocation3], 0  ;;  %s1240_s0 = inlined_call_operand.vmem [shape: f32[8,4], index: 0, kind: input, shape index: {}]   ;;  %s1241_s1 = inlined_call_operand.hbm [shape: f32[4,32], index: 1, kind: input, shape index: {}]   ;;  %s1242_s2 = inlined_call_operand.hbm [shape: f32[1,32], index: 2, kind: input, shape index: {}]   ;;  %s1243_s3 = inlined_call_operand.hbm [shape: f32[32,32], index: 3, kind: input, shape index: {}]   ;;  %s1244_s4 = inlined_call_operand.hbm [shape: f32[1,32], index: 4, kind: input, shape index: {}]   ;;  %s1245_s5 = inlined_call_operand.hbm [shape: f32[32,32], index: 5, kind: input, shape index: {}]   ;;  %s1246_s6 = inlined_call_operand.hbm [shape: f32[1,32], index: 6, kind: input, shape index: {}]   ;;  %s1247_s7 = inlined_call_operand.hbm [shape: f32[32,32], index: 7, kind: input, shape index: {}]   ;;  %s1248_s8 = inlined_call_operand.hbm [shape: f32[1,32], index: 8, kind: input, shape index: {}]   ;;  %s1249_s9 = inlined_call_operand.hbm [shape: f32[32,32], index: 9, kind: input, shape index: {}]   ;;  %s1250_s10 = inlined_call_operand.hbm [shape: f32[1,32], index: 10, kind: input, shape index: {}]   ;;  %s1251_s11 = inlined_call_operand.vmem [shape: f32[32,128], index: 11, kind: input, shape index: {}]   ;;  %s1252_s12 = inlined_call_operand.vmem [shape: f32[1,128], index: 12, kind: input, shape index: {}]   ;;  %s1253_s13 = inlined_call_operand.hbm [shape: f32[8,128], index: 13, kind: output, shape index: {}]  }
   0x1   :  { %19 = vsyncpa [#allocation6], 0 }
   0x2   :  { %20 = vsyncpa [#allocation9], 0 }
   0x3   :  { %21 = vsyncpa [#allocation12], 0 }
   0x4   :  { %22 = vsyncpa [#allocation15], 0 }
   0x5   :  { %23 = vsyncpa [#allocation18], 0 }
   0x6   :  { %24 = vsyncpa [#allocation4], 0  ;;  %s1054_s25 = smov [#allocation5]   ;;  %s1055_s27 = smov [#allocation8]  }
   0x7   :  { %s43_s26 = sshll.u32 %s1054_s25, 4  ;;  %s65_s28 = sshll.u32 %s1055_s27, 4  ;;  %s44_s26 = int_to_ptr.vmem [resolvable:$true] %s43_s26  ;;  %s66_s28 = int_to_ptr.vmem [resolvable:$true] %s65_s28 }
   0x8   :  { %s828_s29 = scalar_lea.vmem %s44_s26, 16  ;;  %s832_s30 = scalar_lea.vmem %s44_s26, 32 }
   0x9   :  { %p829_p0 = scmp.ne.s32.totalorder %s44_s26, %s828_s29  ;;  %p833_p1 = scmp.lt.s32.totalorder %s44_s26, %s44_s26 }
   0xa   :  { %p834_p2 = scmp.lt.s32.totalorder %s832_s30, %s828_s29 }
   0xc   :  { %p835_p3 = por %p834_p2, %p833_p1 }
   0xe   :  { %p836_p4 = pnand %p835_p3, %p829_p0 }
  0x10   :  { %839 = shalt.err (!%p836_p4)
}
  0x11   :  { %46 = dma.hbm_to_vmem [thread:$0]  %s1242_s2, 16, %s44_s26, [#allocation6]  }
  0x12   :  { %s848_s16 = scalar_lea.vmem %s66_s28, 16  ;;  %s852_s17 = scalar_lea.vmem %s66_s28, 32 }
  0x13   :  { %p849_p5 = scmp.ne.s32.totalorder %s66_s28, %s848_s16  ;;  %p853_p6 = scmp.lt.s32.totalorder %s66_s28, %s66_s28 }
  0x14   :  { %p854_p7 = scmp.lt.s32.totalorder %s852_s17, %s848_s16 }
  0x16   :  { %p855_p8 = por %p854_p7, %p853_p6 }
  0x18   :  { %p856_p9 = pnand %p855_p8, %p849_p5 }
  0x1a   :  { %859 = shalt.err (!%p856_p9)
}
  0x1b   :  { %68 = dma.hbm_to_vmem [thread:$0]  %s1244_s4, 16, %s66_s28, [#allocation9]  }
  0x1c   :  { %s1056_s20 = smov [#allocation11]   ;;  %s1057_s22 = smov [#allocation14]  }
  0x1d   :  { %s87_s21 = sshll.u32 %s1056_s20, 4  ;;  %s109_s23 = sshll.u32 %s1057_s22, 4  ;;  %s88_s21 = int_to_ptr.vmem [resolvable:$true] %s87_s21  ;;  %s110_s23 = int_to_ptr.vmem [resolvable:$true] %s109_s23 }
  0x1e   :  { %s868_s24 = scalar_lea.vmem %s88_s21, 16  ;;  %s872_s2 = scalar_lea.vmem %s88_s21, 32 }
  0x1f   :  { %p869_p10 = scmp.ne.s32.totalorder %s88_s21, %s868_s24  ;;  %p873_p11 = scmp.lt.s32.totalorder %s88_s21, %s88_s21 }
  0x20   :  { %p874_p12 = scmp.lt.s32.totalorder %s872_s2, %s868_s24 }
  0x22   :  { %p875_p13 = por %p874_p12, %p873_p11 }
  0x24   :  { %p876_p0 = pnand %p875_p13, %p869_p10 }
  0x26   :  { %879 = shalt.err (!%p876_p0)
}
  0x27   :  { %90 = dma.hbm_to_vmem [thread:$0]  %s1246_s6, 16, %s88_s21, [#allocation12]  }
  0x28   :  { %s888_s27 = scalar_lea.vmem %s110_s23, 16  ;;  %s892_s4 = scalar_lea.vmem %s110_s23, 32 }
  0x29   :  { %p889_p1 = scmp.ne.s32.totalorder %s110_s23, %s888_s27  ;;  %p893_p2 = scmp.lt.s32.totalorder %s110_s23, %s110_s23 }
  0x2a   :  { %p894_p3 = scmp.lt.s32.totalorder %s892_s4, %s888_s27 }
  0x2c   :  { %p895_p4 = por %p894_p3, %p893_p2 }
  0x2e   :  { %p896_p5 = pnand %p895_p4, %p889_p1 }
  0x30   :  { %899 = shalt.err (!%p896_p5)
}
  0x31   :  { %112 = dma.hbm_to_vmem [thread:$0]  %s1248_s8, 16, %s110_s23, [#allocation15]  }
  0x32   :  { %s1058_s30 = smov [#allocation2]   ;;  %s1059_s15 = smov [#allocation7]  }
  0x33   :  { %s33_s14 = sshll.u32 %s1058_s30, 4  ;;  %s52_s16 = sshll.u32 %s1059_s15, 4  ;;  %s34_s14 = int_to_ptr.vmem [resolvable:$true] %s33_s14  ;;  %s53_s16 = int_to_ptr.vmem [resolvable:$true] %s52_s16 }
  0x34   :  { %s908_s17 = scalar_lea.vmem %s34_s14, 64  ;;  %p913_p7 = scmp.lt.s32.totalorder %s34_s14, %s34_s14 }
  0x35   :  { %p909_p6 = scmp.ne.s32.totalorder %s34_s14, %s908_s17  ;;  %p914_p8 = scmp.lt.s32.totalorder %s908_s17, %s908_s17 }
  0x37   :  { %p915_p9 = por %p914_p8, %p913_p7 }
  0x39   :  { %p916_p10 = pnand %p915_p9, %p909_p6 }
  0x3b   :  { %919 = shalt.err (!%p916_p10)
}
  0x3c   :  { %36 = dma.hbm_to_vmem [thread:$0]  %s1241_s1, 64, %s34_s14, [#allocation3]  }
  0x3d   :  { %s928_s19 = scalar_lea.vmem %s53_s16, 512  ;;  %p933_p12 = scmp.lt.s32.totalorder %s53_s16, %s53_s16 }
  0x3e   :  { %p929_p11 = scmp.ne.s32.totalorder %s53_s16, %s928_s19  ;;  %p934_p13 = scmp.lt.s32.totalorder %s928_s19, %s928_s19 }
  0x40   :  { %p935_p0 = por %p934_p13, %p933_p12 }
  0x42   :  { %p936_p1 = pnand %p935_p0, %p929_p11 }
  0x44   :  { %939 = shalt.err (!%p936_p1)
}
  0x45   :  { %s1060_s8 = smov 128   ;;  %s1061_s20 = smov 8  }
  0x46   :  { %58 = dma.hbm_to_vmem [thread:$0]  %s1243_s3, 512, %s53_s16, [#allocation6], %s1060_s8, %s1060_s8, %s1061_s20  }
  0x47   :  { %s1062_s23 = smov [#allocation10]   ;;  %s1063_s2 = smov [#allocation13]  }
  0x48   :  { %s74_s24 = sshll.u32 %s1062_s23, 4  ;;  %s96_s1 = sshll.u32 %s1063_s2, 4  ;;  %s75_s24 = int_to_ptr.vmem [resolvable:$true] %s74_s24  ;;  %s97_s1 = int_to_ptr.vmem [resolvable:$true] %s96_s1 }
  0x49   :  { %s948_s25 = scalar_lea.vmem %s75_s24, 512  ;;  %p953_p3 = scmp.lt.s32.totalorder %s75_s24, %s75_s24 }
  0x4a   :  { %p949_p2 = scmp.ne.s32.totalorder %s75_s24, %s948_s25  ;;  %p954_p4 = scmp.lt.s32.totalorder %s948_s25, %s948_s25 }
  0x4c   :  { %p955_p5 = por %p954_p4, %p953_p3 }
  0x4e   :  { %p956_p6 = pnand %p955_p5, %p949_p2 }
  0x50   :  { %959 = shalt.err (!%p956_p6)
}
  0x51   :  { %80 = dma.hbm_to_vmem [thread:$0]  %s1245_s5, 512, %s75_s24, [#allocation9], %s1060_s8, %s1060_s8, %s1061_s20  }
  0x52   :  { %s968_s3 = scalar_lea.vmem %s97_s1, 512  ;;  %p973_p8 = scmp.lt.s32.totalorder %s97_s1, %s97_s1 }
  0x53   :  { %p969_p7 = scmp.ne.s32.totalorder %s97_s1, %s968_s3  ;;  %p974_p9 = scmp.lt.s32.totalorder %s968_s3, %s968_s3 }
  0x55   :  { %p975_p10 = por %p974_p9, %p973_p8 }
  0x57   :  { %p976_p11 = pnand %p975_p10, %p969_p7 }
  0x59   :  { %979 = shalt.err (!%p976_p11)
}
  0x5a   :  { %102 = dma.hbm_to_vmem [thread:$0]  %s1247_s7, 512, %s97_s1, [#allocation12], %s1060_s8, %s1060_s8, %s1061_s20  }
  0x5b   :  { %s1064_s29 = smov [#allocation16]   ;;  %s1065_s14 = smov [#allocation17]  }
  0x5c   :  { %s118_s30 = sshll.u32 %s1064_s29, 4  ;;  %s131_s15 = sshll.u32 %s1065_s14, 4  ;;  %s119_s30 = int_to_ptr.vmem [resolvable:$true] %s118_s30  ;;  %s132_s15 = int_to_ptr.vmem [resolvable:$true] %s131_s15 }
  0x5d   :  { %s988_s5 = scalar_lea.vmem %s119_s30, 512  ;;  %p993_p13 = scmp.lt.s32.totalorder %s119_s30, %s119_s30 }
  0x5e   :  { %p989_p12 = scmp.ne.s32.totalorder %s119_s30, %s988_s5  ;;  %p994_p0 = scmp.lt.s32.totalorder %s988_s5, %s988_s5 }
  0x60   :  { %p995_p1 = por %p994_p0, %p993_p13 }
  0x62   :  { %p996_p2 = pnand %p995_p1, %p989_p12 }
  0x64   :  { %999 = shalt.err (!%p996_p2)
}
  0x65   :  { %124 = dma.hbm_to_vmem [thread:$0]  %s1249_s9, 512, %s119_s30, [#allocation15], %s1060_s8, %s1060_s8, %s1061_s20  }
  0x66   :  { %s1008_s7 = scalar_lea.vmem %s132_s15, 16  ;;  %s1012_s6 = scalar_lea.vmem %s132_s15, 32 }
  0x67   :  { %p1009_p3 = scmp.ne.s32.totalorder %s132_s15, %s1008_s7  ;;  %p1013_p4 = scmp.lt.s32.totalorder %s132_s15, %s132_s15 }
  0x68   :  { %p1014_p5 = scmp.lt.s32.totalorder %s1012_s6, %s1008_s7 }
  0x6a   :  { %p1015_p6 = por %p1014_p5, %p1013_p4 }
  0x6c   :  { %p1016_p7 = pnand %p1015_p6, %p1009_p3 }
  0x6e   :  { %1019 = shalt.err (!%p1016_p7)
}
  0x6f   :  { %134 = dma.hbm_to_vmem [thread:$0]  %s1250_s10, 16, %s132_s15, [#allocation18]  }
  0x70   :  { %1040 = dma.done.wait [#allocation3], 64  }
  0x71   :  { %1041 = vsyncadd [#allocation3], 4294967232 }
  0x72   :  { %1042 = dma.done.wait [#allocation6], 528  }
  0x73   :  { %1043 = vsyncadd [#allocation6], 4294966768 }
  0x74   :  { %1044 = dma.done.wait [#allocation9], 528  }
  0x75   :  { %1045 = vsyncadd [#allocation9], 4294966768 }
  0x76   :  { %1046 = dma.done.wait [#allocation12], 528  }
  0x77   :  { %1047 = vsyncadd [#allocation12], 4294966768 }
  0x78   :  { %1048 = dma.done.wait [#allocation15], 528  }
  0x79   :  { %1049 = vsyncadd [#allocation15], 4294966768 }
  0x7a   :  { %1050 = dma.done.wait [#allocation18], 16  }
  0x7b   :  { %1051 = vsyncadd [#allocation18], 4294967280  ;;  %v1066_v0 = vmov 0.0   ;;  %vm1067_vm0 = vmmov 0   ;;  %vm182_vm1 = vcmask 1043456   ;;  %vm178_vm2 = vcmask 31744  }
  0x7c   :  { %745 = vmatprep.subr.mxu0 %v1066_v0  ;;  %747 = vmatprep.mubr.msk.f32.mxu0 %vm1067_vm0, %v1066_v0  ;;  %v170_v1 = vld [vmem:[#allocation2] sm:$0xf]  ;;  %v259_v4 = vld [vmem:[#allocation7 + $0x10] sm:$0xff]  ;;  %v258_v5 = vld [vmem:[#allocation7 + $0x8] sm:$0xff]  ;;  %vm273_vm3 = vcmask 261120   ;;  %s1068_s26 = smov [#allocation19]  }
  0x7d   :  { %750 = vmatprep.subr.mxu1 %v1066_v0  ;;  %758 = vmatprep.mubr.msk.f32.mxu1 %vm1067_vm0, %v1066_v0  ;;  %v169_v2 = vld [vmem:[%s1240_s0] sm:$0xff]  ;;  %v264_v13 = vld [vmem:[#allocation10 + $0x10] sm:$0xff]  ;;  %v263_v14 = vld [vmem:[#allocation10 + $0x8] sm:$0xff]  ;;  %s691_s27 = sshll.u32 %s1068_s26, 4  ;;  %s692_s27 = int_to_ptr.vmem [resolvable:$true] %s691_s27 }
  0x7e   :  { %v260_v3 = vld [vmem:[#allocation7 + $0x18] sm:$0xff]  ;;  %746 = vmatpush3.msk.msra.mxu0 %vm182_vm1, %v170_v1  ;;  %v257_v6 = vld [vmem:[#allocation7] sm:$0xff]  ;;  %v430_v23 = vld [vmem:[#allocation13 + $0x8] sm:$0xff]  ;;  %p1025_p9 = scmp.lt.s32.totalorder %s692_s27, %s692_s27 }
  0x7f   :  { %751 = vmatpush3.msra.mxu1 %v260_v3  ;;  %748 = vmatmul.mubr.msk.f32.vlgmr.msra.gmra.mxu0 %vm178_vm2, %v169_v2  ;;  %v265_v7 = vld [vmem:[#allocation10 + $0x18] sm:$0xff]  ;;  %v262_v15 = vld [vmem:[#allocation10] sm:$0xff]  ;;  %v435_v33 = vld [vmem:[#allocation16 + $0x8] sm:$0xff] }
  0x80   :  { %752 = vmatprep.subr.mxu1 %v1066_v0  ;;  %761 = vmatprep.subr.mxu0 %v1066_v0  ;;  %v705_v8 = vld [vmem:[#allocation5] ss:$0 sm:$0xff]  ;;  %v708_v16 = vld [vmem:[#allocation8] ss:$0 sm:$0xff]  ;;  %v431_v22 = vld [vmem:[#allocation13 + $0x10] sm:$0xff] }
  0x81   :  { %769 = vmatprep.mubr.msk.f32.mxu0 %vm1067_vm0, %v1066_v0  ;;  %753 = vmatpush3.msra.mxu1 %v259_v4  ;;  %v432_v21 = vld [vmem:[#allocation13 + $0x18] sm:$0xff]  ;;  %v429_v24 = vld [vmem:[#allocation13] sm:$0xff]  ;;  %v603_v40 = vld [vmem:[%s1251_s11 + $0x18] sm:$0xff] }
  0x82   :  { %754 = vmatprep.subr.mxu1 %v1066_v0  ;;  %762 = vmatpush3.msra.mxu0 %v265_v7  ;;  %v437_v25 = vld [vmem:[#allocation16 + $0x18] sm:$0xff]  ;;  %v436_v32 = vld [vmem:[#allocation16 + $0x10] sm:$0xff]  ;;  %v434_v34 = vld [vmem:[#allocation16] sm:$0xff] }
  0x83   :  { %755 = vmatpush3.msra.mxu1 %v258_v5  ;;  %763 = vmatprep.subr.mxu0 %v1066_v0  ;;  %v710_v26 = vld [vmem:[#allocation11] ss:$0 sm:$0xff]  ;;  %v712_v35 = vld [vmem:[#allocation14] ss:$0 sm:$0xff]  ;;  %v602_v41 = vld [vmem:[%s1251_s11 + $0x10] sm:$0xff] }
  0x84   :  { %756 = vmatprep.subr.mxu1 %v1066_v0  ;;  %764 = vmatpush3.msra.mxu0 %v264_v13  ;;  %v601_v42 = vld [vmem:[%s1251_s11 + $0x8] sm:$0xff]  ;;  %v600_v43 = vld [vmem:[%s1251_s11] sm:$0xff]  ;;  %s1020_s11 = scalar_lea.vmem %s692_s27, 128 }
  0x85   :  { %757 = vmatpush3.msra.mxu1 %v257_v6  ;;  %765 = vmatprep.subr.mxu0 %v1066_v0  ;;  %v714_v44 = vld [vmem:[#allocation17] ss:$0 sm:$0xff]  ;;  %v716_v50 = vld [vmem:[%s1252_s12] ss:$0 sm:$0xff]  ;;  %p1021_p8 = scmp.ne.s32.totalorder %s692_s27, %s1020_s11  ;;  %p1026_p10 = scmp.lt.s32.totalorder %s1020_s11, %s1020_s11 }
  0x86   :  { %772 = vmatprep.subr.mxu1 %v1066_v0  ;;  %766 = vmatpush3.msra.mxu0 %v263_v14 }
  0x87   :  { %767 = vmatprep.subr.mxu0 %v1066_v0  ;;  %p1027_p11 = por %p1026_p10, %p1025_p9 }
  0x88   :  { %768 = vmatpush3.msra.mxu0 %v262_v15 }
  0x89   :  { %783 = vmatprep.subr.mxu0 %v1066_v0  ;;  %p1028_p12 = pnand %p1027_p11, %p1021_p8 }
 0x13f   :  { %v252_v9 = vpop.f32.mrf.mxu0 }
 0x140   :  { %v253_v10 = vadd.f32 %v705_v8, %v252_v9 }
 0x141   :  { %v749_v11 = vpop.f32.mrf.mxu0 }
 0x142   :  { %v256_v12 = vmax.f32 %v253_v10, 0.0 }
 0x144   :  { %759 = vmatmul.mubr.msk.f32.vlgmr.msra.gmra.mxu1 %vm273_vm3, %v256_v12 }
 0x145   :  { %780 = vmatprep.mubr.msk.f32.mxu1 %vm1067_vm0, %v1066_v0  ;;  %773 = vmatpush3.msra.mxu1 %v432_v21 }
 0x146   :  { %774 = vmatprep.subr.mxu1 %v1066_v0 }
 0x147   :  { %775 = vmatpush3.msra.mxu1 %v431_v22 }
 0x148   :  { %776 = vmatprep.subr.mxu1 %v1066_v0 }
 0x149   :  { %777 = vmatpush3.msra.mxu1 %v430_v23 }
 0x14a   :  { %778 = vmatprep.subr.mxu1 %v1066_v0 }
 0x14b   :  { %779 = vmatpush3.msra.mxu1 %v429_v24 }
 0x14c   :  { %794 = vmatprep.subr.mxu1 %v1066_v0 }
 0x204   :  { %v343_v17 = vpop.f32.mrf.mxu1 }
 0x205   :  { %v344_v18 = vadd.f32 %v708_v16, %v343_v17 }
 0x206   :  { %v760_v19 = vpop.f32.mrf.mxu1 }
 0x207   :  { %v347_v20 = vmax.f32 %v344_v18, 0.0 }
 0x209   :  { %770 = vmatmul.mubr.msk.f32.vlgmr.msra.gmra.mxu0 %vm273_vm3, %v347_v20 }
 0x20a   :  { %791 = vmatprep.mubr.msk.f32.mxu0 %vm1067_vm0, %v1066_v0  ;;  %784 = vmatpush3.msra.mxu0 %v437_v25 }
 0x20b   :  { %785 = vmatprep.subr.mxu0 %v1066_v0 }
 0x20c   :  { %786 = vmatpush3.msra.mxu0 %v436_v32 }
 0x20d   :  { %787 = vmatprep.subr.mxu0 %v1066_v0 }
 0x20e   :  { %788 = vmatpush3.msra.mxu0 %v435_v33 }
 0x20f   :  { %789 = vmatprep.subr.mxu0 %v1066_v0 }
 0x210   :  { %790 = vmatpush3.msra.mxu0 %v434_v34 }
 0x2c9   :  { %v423_v27 = vpop.f32.mrf.mxu0 }
 0x2ca   :  { %v424_v28 = vadd.f32 %v710_v26, %v423_v27 }
 0x2cb   :  { %v771_v29 = vpop.f32.mrf.mxu0 }
 0x2cc   :  { %v427_v30 = vadd.f32 %v424_v28, %v256_v12 }
 0x2ce   :  { %v428_v31 = vmax.f32 %v427_v30, 0.0 }
 0x2d0   :  { %781 = vmatmul.mubr.msk.f32.vlgmr.msra.gmra.mxu1 %vm273_vm3, %v428_v31 }
 0x2d1   :  { %802 = vmatprep.mubr.msk.f32.mxu1 %vm1067_vm0, %v1066_v0  ;;  %795 = vmatpush3.msra.mxu1 %v603_v40 }
 0x2d2   :  { %796 = vmatprep.subr.mxu1 %v1066_v0 }
 0x2d3   :  { %797 = vmatpush3.msra.mxu1 %v602_v41 }
 0x2d4   :  { %798 = vmatprep.subr.mxu1 %v1066_v0 }
 0x2d5   :  { %799 = vmatpush3.msra.mxu1 %v601_v42 }
 0x2d6   :  { %800 = vmatprep.subr.mxu1 %v1066_v0 }
 0x2d7   :  { %801 = vmatpush3.msra.mxu1 %v600_v43 }
 0x390   :  { %v514_v36 = vpop.f32.mrf.mxu1 }
 0x391   :  { %v515_v37 = vadd.f32 %v712_v35, %v514_v36 }
 0x392   :  { %v782_v38 = vpop.f32.mrf.mxu1 }
 0x393   :  { %v518_v39 = vmax.f32 %v515_v37, 0.0 }
 0x395   :  { %792 = vmatmul.mubr.msk.f32.vlgmr.msra.gmra.mxu0 %vm273_vm3, %v518_v39 }
 0x455   :  { %v594_v45 = vpop.f32.mrf.mxu0 }
 0x456   :  { %v595_v46 = vadd.f32 %v714_v44, %v594_v45 }
 0x457   :  { %v793_v47 = vpop.f32.mrf.mxu0 }
 0x458   :  { %v598_v48 = vadd.f32 %v595_v46, %v428_v31 }
 0x45a   :  { %v599_v49 = vmax.f32 %v598_v48, 0.0 }
 0x45c   :  { %803 = vmatmul.mubr.msk.f32.vlgmr.msra.gmra.mxu1 %vm273_vm3, %v599_v49 }
 0x51c   :  { %v680_v51 = vpop.f32.mrf.mxu1 }
 0x51d   :  { %v681_v52 = vadd.f32 %v716_v50, %v680_v51 }
 0x51e   :  { %v804_v53 = vpop.f32.mrf.mxu1 }
 0x51f   :  { %684 = vst [vmem:[#allocation19] sm:$0xff] %v681_v52 }
 0x520   :  { %1031 = shalt.err (!%p1028_p12)
}
 0x521   :  { %694 = dma.vmem_to_hbm [thread:$0]  %s692_s27, 128, %s1253_s13, [#allocation4]  }
 0x522   :  { %1052 = dma.done.wait [#allocation4], 128  }
 0x523   :  { %1053 = vsyncadd [#allocation4], 4294967168 }
 0x524   :  { %698 = vsyncpa [#allocation3], 1 }
 0x525   :  { %699 = vsyncpa [#allocation6], 1 }
 0x526   :  { %700 = vsyncpa [#allocation9], 1 }
 0x527   :  { %701 = vsyncpa [#allocation12], 1 }
 0x528   :  { %702 = vsyncpa [#allocation15], 1 }
 0x529   :  { %703 = vsyncpa [#allocation18], 1 }
 0x52a   :  { %704 = vsyncpa [#allocation4], 1 }

</bundles_post_ra>
